<compile_context>
chip_gen: v5e
topology: v5e:2x2
jax: 0.10.0
libtpu: 0.0.40
codegen_flags: <defaults>
</compile_context>

<pallas_src>
import functools

import jax
import jax.numpy as jnp
from jax.experimental import pallas as pl
from jax.experimental.pallas import tpu as pltpu


# ---------------------------------------------------------------------------
# Kernel: row-tiled KL accumulation with init/finalize via pl.when.
# ---------------------------------------------------------------------------
def _kl_div_kernel(s_ref, w_ref, t_ref, o_ref, acc_ref):
    """Accumulate per-tile KL contributions; finalize with weight & H.

    s_ref : SMEM (2,) f32 scalar-prefetch = [weight, H],  H = sum(t * log t).
    w_ref : VMEM (TILE_R, C) block of logits.
    t_ref : VMEM (TILE_R, C) block of the target distribution.
    o_ref : VMEM (1, 1) output (resident across the grid).
    acc_ref: VMEM (1, 1) f32 accumulator scratch.
    """
    i = pl.program_id(0)

    @pl.when(i == 0)
    def _init():
        acc_ref[...] = jnp.zeros_like(acc_ref)

    w = w_ref[...].astype(jnp.float32)   # (TILE_R, C)
    t = t_ref[...].astype(jnp.float32)   # (TILE_R, C)

    # Numerically-stable per-row log_softmax normalizer: m + lse.
    m = jnp.max(w, axis=1, keepdims=True)                            # (TILE_R, 1)
    lse = jnp.log(jnp.sum(jnp.exp(w - m), axis=1, keepdims=True))    # (TILE_R, 1)

    # Exact (no "rows of t sum to 1" assumption):
    #   sum(t * (m + lse)) = sum_rows( rowsum(t) * (m + lse) )
    t_row = jnp.sum(t, axis=1, keepdims=True)                        # (TILE_R, 1)
    partial = (jnp.sum(t_row * (m + lse), keepdims=True)
               - jnp.sum(t * w, keepdims=True))                      # (1, 1)
    acc_ref[...] += partial

    @pl.when(i == pl.num_programs(0) - 1)
    def _finalize():
        o_ref[...] = s_ref[0] * (s_ref[1] + acc_ref[...])


# ---------------------------------------------------------------------------
# Wrappers.
# ---------------------------------------------------------------------------
# v7x-safe double-buffered input budget (2 inputs x 2 pipeline buffers).
_VMEM_TILE_BUDGET = 24 * 1024 * 1024
_VMEM_LIMIT_BYTES = 48 * 1024 * 1024


def _kl_pallas_call(scalars, weights, target, tile_rows=None):
    """Run the tiled Pallas kernel. Pads rows with zeros if needed (zero rows
    contribute exactly 0 to every accumulated term)."""
    r, c = weights.shape
    itemsize = max(jnp.dtype(weights.dtype).itemsize,
                   jnp.dtype(target.dtype).itemsize)

    if tile_rows is None:
        max_tile_r = _VMEM_TILE_BUDGET // (2 * 2 * c * itemsize)
        if r <= max_tile_r:
            tile_r = r                                  # single step, no padding
        else:
            tile_r = max(8, (max_tile_r // 8) * 8)      # multiple of 8 sublanes
    else:
        tile_r = int(tile_rows)

    r_pad = pl.cdiv(r, tile_r) * tile_r
    if r_pad != r:
        weights = jnp.pad(weights, ((0, r_pad - r), (0, 0)))
        target = jnp.pad(target, ((0, r_pad - r), (0, 0)))
    n_tiles = r_pad // tile_r

    out = pl.pallas_call(
        _kl_div_kernel,
        out_shape=jax.ShapeDtypeStruct((1, 1), jnp.float32),
        grid_spec=pltpu.PrefetchScalarGridSpec(
            num_scalar_prefetch=1,
            grid=(n_tiles,),
            in_specs=[
                pl.BlockSpec((tile_r, c), lambda i, s: (i, 0)),   # weights
                pl.BlockSpec((tile_r, c), lambda i, s: (i, 0)),   # target
            ],
            out_specs=pl.BlockSpec((1, 1), lambda i, s: (0, 0)),
            scratch_shapes=[pltpu.VMEM((1, 1), jnp.float32)],
        ),
        compiler_params=pltpu.CompilerParams(
            dimension_semantics=("arbitrary",),
            vmem_limit_bytes=_VMEM_LIMIT_BYTES,
        ),
    )(scalars, weights, target)
    return out[0, 0]


def _precompute_scalars(target_distribution, weight):
    """(2,) f32 = [weight, H] with H = sum(t*log t), 0*log(0) := 0 (grad-safe)."""
    t32 = jnp.asarray(target_distribution, jnp.float32)
    safe_t = jnp.where(t32 > 0, t32, 1.0)
    h = jnp.sum(jnp.where(t32 > 0, t32 * jnp.log(safe_t), 0.0))
    return jnp.stack([jnp.asarray(weight, jnp.float32), h])


def make_kl_regularizer(target_distribution, weight=1.0, tile_rows=None):
    """Factory mirroring the nn.Module: H / scalars computed once at init."""
    scalars = _precompute_scalars(target_distribution, weight)

    def forward(weights):
        return _kl_pallas_call(scalars, weights, target_distribution, tile_rows)

    return forward


def kl_divergence_regularizer(weights, target_distribution, weight=1.0,
                              tile_rows=None):
    """Convenience one-shot wrapper (recomputes H; prefer make_kl_regularizer)."""
    scalars = _precompute_scalars(target_distribution, weight)
    return _kl_pallas_call(scalars, weights, target_distribution, tile_rows)


def kl_divergence_regularizer_xla(weights, target_distribution, weight=1.0):
    """Pure-jnp path for tiny shapes (e.g. the module's real (3,10)): fuse this
    into the surrounding jit instead of paying pallas_call dispatch/DMA."""
    t = jnp.asarray(target_distribution, jnp.float32)
    log_p = jax.nn.log_softmax(weights.astype(jnp.float32), axis=1)
    safe_t = jnp.where(t > 0, t, 1.0)
    return weight * jnp.sum(jnp.where(t > 0, t * (jnp.log(safe_t) - log_p),
                                      -t * log_p))


def make_target_distribution(key):
    """Deterministic re-implementation of custom_t_distribution (shape (3,10))."""
    t = jax.random.randint(key, (3, 10), 1, 10).astype(jnp.float32)
    t = 0.1 * t
    sorted_t = -jnp.sort(-t, axis=1)                 # sort descending along dim=1
    return jax.nn.softmax(sorted_t, axis=1)


if __name__ == "__main__":
    key = jax.random.PRNGKey(0)
    k_t, k_w = jax.random.split(key)

    # Module-consistent shapes: target (3,10), input weights (3,10).
    target = make_target_distribution(k_t)
    weights = jax.random.normal(k_w, (3, 10), dtype=jnp.float32)

    reg = make_kl_regularizer(target, weight=1.0)     # H precomputed once
    result = reg(weights)
    jax.block_until_ready(result)

    # Pure-JAX reference (same math as F.kl_div(F.log_softmax(w,1), t, 'sum')).
    log_p_ref = jax.nn.log_softmax(weights, axis=1)
    ref = jnp.sum(target * (jnp.log(target) - log_p_ref))
    assert jnp.allclose(result, ref, rtol=1e-5, atol=1e-5), (result, ref)

    # Exercise the row-tiled accumulator path (multi-step grid + zero-row pad).
    k2_t, k2_w = jax.random.split(jax.random.PRNGKey(1))
    big_t = jax.nn.softmax(jax.random.normal(k2_t, (40, 256), jnp.float32), axis=1)
    big_w = jax.random.normal(k2_w, (40, 256), dtype=jnp.float32)
    big_res = kl_divergence_regularizer(big_w, big_t, weight=0.5, tile_rows=16)
    jax.block_until_ready(big_res)
    big_ref = 0.5 * jnp.sum(big_t * (jnp.log(big_t)
                                     - jax.nn.log_softmax(big_w, axis=1)))
    assert jnp.allclose(big_res, big_ref, rtol=1e-4, atol=1e-4), (big_res, big_ref)

    print("KERNEL_OK")
</pallas_src>

<mosaic_0001>
module attributes {stable_mosaic.version = 11 : i64} {
  func.func @_kl_div_kernel(%arg0: i32, %arg1: memref<2xf32, #tpu.memory_space<smem>>, %arg2: memref<3x10xf32, #tpu.memory_space<vmem>>, %arg3: memref<3x10xf32, #tpu.memory_space<vmem>>, %arg4: memref<1x1xf32, #tpu.memory_space<vmem>>, %arg5: memref<1x1xf32, #tpu.memory_space<vmem>>) attributes {dimension_semantics = [#tpu.dimension_semantics<arbitrary>], iteration_bounds = array<i64: 1>, scalar_prefetch = 1 : i64, scratch_operands = 1 : i64, tpu.core_type = #tpu.core_type<tc>, window_params = [{transform_indices = @transform_0, window_bounds = array<i64: 3, 10>}, {transform_indices = @transform_1, window_bounds = array<i64: 3, 10>}, {pipeline_mode = #tpu.pipeline_mode<synchronous>, transform_indices = @transform_2, window_bounds = array<i64: 1, 1>}]} {
    %c0_i32 = arith.constant 0 : i32
    %0 = arith.cmpi eq, %arg0, %c0_i32 : i32
    %1 = arith.extui %0 : i1 to i32
    %c0_i32_0 = arith.constant 0 : i32
    %2 = arith.cmpi ne, %1, %c0_i32_0 : i32
    scf.if %2 {
      %cst_14 = arith.constant 0.000000e+00 : f32
      %35 = vector.broadcast %cst_14 : f32 to vector<1x1xf32>
      %c0_15 = arith.constant 0 : index
      %c0_16 = arith.constant 0 : index
      %36 = vector.load %arg5[%c0_15, %c0_16] : memref<1x1xf32, #tpu.memory_space<vmem>>, vector<1x1xf32>
      tpu.vector_store %arg5[%c0_15, %c0_16], %35 {strides = array<i32>} : memref<1x1xf32, #tpu.memory_space<vmem>>, vector<1x1xf32>,
    } else {
    }
    %c0 = arith.constant 0 : index
    %c0_1 = arith.constant 0 : index
    %3 = vector.load %arg2[%c0, %c0_1] : memref<3x10xf32, #tpu.memory_space<vmem>>, vector<3x10xf32>
    %c0_2 = arith.constant 0 : index
    %c0_3 = arith.constant 0 : index
    %4 = vector.load %arg3[%c0_2, %c0_3] : memref<3x10xf32, #tpu.memory_space<vmem>>, vector<3x10xf32>
    %cst = arith.constant dense<0xFF800000> : vector<3xf32>
    %5 = vector.multi_reduction <maximumf>, %3, %cst [1] : vector<3x10xf32> to vector<3xf32>
    %6 = vector.shape_cast %5 : vector<3xf32> to vector<3x1xf32>
    %7 = vector.broadcast %6 : vector<3x1xf32> to vector<3x10xf32>
    %8 = arith.subf %3, %7 : vector<3x10xf32>
    %9 = math.exp %8 : vector<3x10xf32>
    %cst_4 = arith.constant dense<0.000000e+00> : vector<3xf32>
    %10 = vector.multi_reduction <add>, %9, %cst_4 [1] : vector<3x10xf32> to vector<3xf32>
    %11 = vector.shape_cast %10 : vector<3xf32> to vector<3x1xf32>
    %12 = math.log %11 : vector<3x1xf32>
    %cst_5 = arith.constant dense<0.000000e+00> : vector<3xf32>
    %13 = vector.multi_reduction <add>, %4, %cst_5 [1] : vector<3x10xf32> to vector<3xf32>
    %14 = vector.shape_cast %13 : vector<3xf32> to vector<3x1xf32>
    %15 = arith.addf %6, %12 : vector<3x1xf32>
    %16 = arith.mulf %14, %15 : vector<3x1xf32>
    %17 = vector.shape_cast %16 : vector<3x1xf32> to vector<1x3x1xf32>
    %cst_6 = arith.constant dense<0.000000e+00> : vector<1xf32>
    %18 = vector.multi_reduction <add>, %17, %cst_6 [1, 2] : vector<1x3x1xf32> to vector<1xf32>
    %19 = vector.shape_cast %18 : vector<1xf32> to vector<1x1x1xf32>
    %20 = vector.extract %19[0, 0, 0] : f32 from vector<1x1x1xf32>
    %21 = vector.broadcast %20 : f32 to vector<1x1xf32>
    %22 = arith.mulf %4, %3 : vector<3x10xf32>
    %23 = vector.shape_cast %22 : vector<3x10xf32> to vector<1x3x10xf32>
    %cst_7 = arith.constant dense<0.000000e+00> : vector<1xf32>
    %24 = vector.multi_reduction <add>, %23, %cst_7 [1, 2] : vector<1x3x10xf32> to vector<1xf32>
    %25 = vector.shape_cast %24 : vector<1xf32> to vector<1x1x1xf32>
    %26 = vector.extract %25[0, 0, 0] : f32 from vector<1x1x1xf32>
    %27 = vector.broadcast %26 : f32 to vector<1x1xf32>
    %28 = arith.subf %21, %27 : vector<1x1xf32>
    %c0_8 = arith.constant 0 : index
    %c0_9 = arith.constant 0 : index
    %29 = vector.load %arg5[%c0_8, %c0_9] : memref<1x1xf32, #tpu.memory_space<vmem>>, vector<1x1xf32>
    %30 = arith.addf %29, %28 : vector<1x1xf32>
    %c0_10 = arith.constant 0 : index
    %c0_11 = arith.constant 0 : index
    %31 = vector.load %arg5[%c0_10, %c0_11] : memref<1x1xf32, #tpu.memory_space<vmem>>, vector<1x1xf32>
    tpu.vector_store %arg5[%c0_10, %c0_11], %30 {strides = array<i32>} : memref<1x1xf32, #tpu.memory_space<vmem>>, vector<1x1xf32>,
    %c0_i32_12 = arith.constant 0 : i32
    %32 = arith.cmpi eq, %arg0, %c0_i32_12 : i32
    %33 = arith.extui %32 : i1 to i32
    %c0_i32_13 = arith.constant 0 : i32
    %34 = arith.cmpi ne, %33, %c0_i32_13 : i32
    scf.if %34 {
      %c0_14 = arith.constant 0 : index
      %35 = memref.load %arg1[%c0_14] : memref<2xf32, #tpu.memory_space<smem>>
      %c1 = arith.constant 1 : index
      %36 = memref.load %arg1[%c1] : memref<2xf32, #tpu.memory_space<smem>>
      %c0_15 = arith.constant 0 : index
      %c0_16 = arith.constant 0 : index
      %37 = vector.load %arg5[%c0_15, %c0_16] : memref<1x1xf32, #tpu.memory_space<vmem>>, vector<1x1xf32>
      %38 = vector.broadcast %36 : f32 to vector<1x1xf32>
      %39 = arith.addf %38, %37 : vector<1x1xf32>
      %40 = vector.broadcast %35 : f32 to vector<1x1xf32>
      %41 = arith.mulf %40, %39 : vector<1x1xf32>
      %c0_17 = arith.constant 0 : index
      %c0_18 = arith.constant 0 : index
      %42 = vector.load %arg4[%c0_17, %c0_18] : memref<1x1xf32, #tpu.memory_space<vmem>>, vector<1x1xf32>
      tpu.vector_store %arg4[%c0_17, %c0_18], %41 {strides = array<i32>} : memref<1x1xf32, #tpu.memory_space<vmem>>, vector<1x1xf32>,
    } else {
    }
    return
  }
  func.func @transform_0(%arg0: i32, %arg1: memref<2xf32, #tpu.memory_space<smem>>) -> (i32, i32) {
    %c0_i32 = arith.constant 0 : i32
    %c0_i32_0 = arith.constant 0 : i32
    return %arg0, %c0_i32 : i32, i32
  }
  func.func @transform_1(%arg0: i32, %arg1: memref<2xf32, #tpu.memory_space<smem>>) -> (i32, i32) {
    %c0_i32 = arith.constant 0 : i32
    %c0_i32_0 = arith.constant 0 : i32
    return %arg0, %c0_i32 : i32, i32
  }
  func.func @transform_2(%arg0: i32, %arg1: memref<2xf32, #tpu.memory_space<smem>>) -> (i32, i32) {
    %c0_i32 = arith.constant 0 : i32
    %c0_i32_0 = arith.constant 0 : i32
    %c0_i32_1 = arith.constant 0 : i32
    return %c0_i32, %c0_i32_0 : i32, i32
  }
}

</mosaic_0001>

<bundles_post_ra>
// kernel: tpu_custom_call.1
= control target key start
LH: loop header
LB: loop body
LE: loop exit
PB: predicated region body
PF: predicated region fallthrough
CT: control target
= control target key end

     0   :  { %s238_s15 = smov [#allocation4]   ;;  %s278_s0 = inlined_call_operand.hbm [shape: f32[2], index: 0, kind: input, shape index: {}]   ;;  %s279_s1 = inlined_call_operand.hbm [shape: f32[3,10], index: 1, kind: input, shape index: {}]   ;;  %s280_s2 = inlined_call_operand.hbm [shape: f32[3,10], index: 2, kind: input, shape index: {}]   ;;  %s281_s3 = inlined_call_operand.hbm [shape: f32[1,1], index: 3, kind: output, shape index: {}]  }
   0x1   :  { %s9_s14 = sshll.u32 %s278_s0, 4  ;;  %s10_s14 = int_to_ptr.hbm [resolvable:$true] %s9_s14 }
   0x2   :  { %12 = dma.hbm_to_smem %s10_s14, 16, %s238_s15, [#allocation3] }
   0x3   :  { %230 = dma.done.wait [#allocation3], 16 }
   0x4   :  { %231 = vsyncadd [#allocation3], 4294967280 }
   0x5   :  { %15 = sfence }
   0x6   :  { %16 = vsyncpa [#allocation6], 0 }
   0x7   :  { %17 = vsyncpa [#allocation9], 0 }
   0x8   :  { %18 = vsyncpa [#allocation7], 0  ;;  %s24_s18 = sshll.u32 %s279_s1, 4  ;;  %s239_s19 = smov [#allocation5]   ;;  %s25_s18 = int_to_ptr.hbm [resolvable:$true] %s24_s18 }
   0x9   :  { %s26_s20 = sshll.u32 %s239_s19, 4  ;;  %s35_s0 = sshll.u32 %s280_s2, 4  ;;  %s27_s20 = int_to_ptr.vmem [resolvable:$true] %s26_s20  ;;  %s36_s0 = int_to_ptr.hbm [resolvable:$true] %s35_s0 }
   0xa   :  { %29 = dma.hbm_to_vmem [thread:$0]  %s25_s18, 64, %s27_s20, [#allocation6]  }
   0xb   :  { %s240_s23 = smov [#allocation8]  }
   0xc   :  { %s37_s24 = sshll.u32 %s240_s23, 4  ;;  %s38_s24 = int_to_ptr.vmem [resolvable:$true] %s37_s24 }
   0xd   :  { %40 = dma.hbm_to_vmem [thread:$0]  %s36_s0, 64, %s38_s24, [#allocation9]  }
   0xe   :  { %232 = dma.done.wait [#allocation6], 64  }
   0xf   :  { %233 = vsyncadd [#allocation6], 4294967232 }
  0x10   :  { %234 = dma.done.wait [#allocation9], 64  }
  0x11   :  { %235 = vsyncadd [#allocation9], 4294967232  ;;  %vm57_vm0 = vcmask 75776   ;;  %v55_v0 = vld [vmem:[#allocation5] sm:$0x7]  ;;  %vm74_vm1 = vcmask 2048  }
  0x12   :  { %v58_v1 = vsel %vm57_vm0, %v55_v0, -inf  ;;  %v56_v2 = vld [vmem:[#allocation8] sm:$0x7]  ;;  %vm53_vm2 = vcmask 0   ;;  %v241_v32 = vmov 0.0   ;;  %s132_s25 = sld [smem:[#allocation4 + $0x1]] }
  0x13   :  { %59 = vmax.xlane.f32.xlu0 %v58_v1  ;;  %v69_v3 = vsel %vm57_vm0, %v56_v2, 0.0  ;;  %v86_v9 = vmul.f32 %v56_v2, %v55_v0  ;;  %54 = vst.msk [vmem:[#allocation2] sm:$0x1] %vm53_vm2, %v241_v32  ;;  %s106_s26 = sld [smem:[#allocation4]]  ;;  %s242_s27 = smov [#allocation10]  }
  0x14   :  { %70 = vadd.xlane.f32.xlu1 %v69_v3  ;;  %s119_s28 = sshll.u32 %s242_s27, 4  ;;  %s121_s4 = sshll.u32 %s281_s3, 4  ;;  %s120_s28 = int_to_ptr.vmem [resolvable:$true] %s119_s28  ;;  %s122_s4 = int_to_ptr.hbm [resolvable:$true] %s121_s4 }
  0x15   :  { %v87_v10 = vsel %vm57_vm0, %v86_v9, 0.0 }
  0x16   :  { %88 = vadd.xlane.f32.xlu2 %v87_v10 }
  0x18   :  { %v109_v38 = vstv %s132_s25 }
  0x19   :  { %v111_v40 = vstv %s106_s26 }
  0x1a   :  { %v99_v35 = vld [vmem:[#allocation2] sm:$0x1] }
  0x86   :  { %v60_v4 = vpop.xlane.xlu0 %59 }
  0x87   :  { %v61_v5 = vsub.f32 %v55_v0, %v60_v4  ;;  %v71_v14 = vpop.xlane.xlu1 %70 }
  0x89   :  { %v62_v6 = vmul.f32 1.442695, %v61_v5  ;;  %v89_v18 = vpop.xlane.xlu2 %88 }
  0x8a   :  { %v90_v19 = vrot.slane %v89_v18, 4 }
  0x8b   :  { %142 = vpow2.f32 %v62_v6 }
  0x8c   :  { %v91_v20 = vadd.f32 %v90_v19, %v89_v18 }
  0x8e   :  { %v92_v21 = vrot.slane %v91_v20, 2 }
  0x90   :  { %v93_v25 = vadd.f32 %v92_v21, %v91_v20 }
  0x91   :  { %v143_v7 = vpop.eup %142 }
  0x92   :  { %v64_v8 = vsel %vm57_vm0, %v143_v7, 0.0  ;;  %v94_v28 = vrot.slane %v93_v25, 1 }
  0x93   :  { %65 = vadd.xlane.f32.xlu0 %v64_v8 }
  0x94   :  { %v95_v31 = vadd.f32 %v94_v28, %v93_v25 }
 0x106   :  { %v66_v11 = vpop.xlane.xlu0 %65 }
 0x107   :  { %144 = vlog2.f32 %v66_v11 }
 0x10d   :  { %v145_v12 = vpop.eup %144 }
 0x10e   :  { %v68_v13 = vmul.f32 0.6931472, %v145_v12 }
 0x110   :  { %v72_v15 = vadd.f32 %v68_v13, %v60_v4 }
 0x112   :  { %v73_v16 = vmul.f32 %v72_v15, %v71_v14 }
 0x114   :  { %v75_v17 = vsel %vm74_vm1, %v73_v16, 0.0 }
 0x115   :  { %76 = vadd.xlane.f32.xlu1 %v75_v17 }
 0x188   :  { %v77_v22 = vpop.xlane.xlu1 %76 }
 0x189   :  { %v78_v23 = vrot.slane %v77_v22, 4 }
 0x18b   :  { %v79_v24 = vadd.f32 %v78_v23, %v77_v22 }
 0x18d   :  { %v80_v26 = vrot.slane %v79_v24, 2 }
 0x18f   :  { %v81_v27 = vadd.f32 %v80_v26, %v79_v24 }
 0x191   :  { %v82_v29 = vrot.slane %v81_v27, 1 }
 0x193   :  { %v83_v30 = vadd.f32 %v82_v29, %v81_v27 }
 0x195   :  { %133 = vpush %v83_v30 }
 0x196   :  { %135 = vpush %v95_v31 }
 0x1c6   :  { %s134_s1 = spop %133 }
 0x1c7   :  { %v85_v33 = vstv %s134_s1  ;;  %s136_s2 = spop %135 }
 0x1c8   :  { %v97_v34 = vstv %s136_s2 }
 0x1c9   :  { %v98_v36 = vsub.f32 %v85_v33, %v97_v34 }
 0x1cb   :  { %v100_v37 = vadd.f32 %v99_v35, %v98_v36 }
 0x1cd   :  { %102 = vst.msk [vmem:[#allocation2] sm:$0x1] %vm53_vm2, %v100_v37 }
 0x1d4   :  { %v108_v39 = vld [vmem:[#allocation2] sm:$0x1] }
 0x1d5   :  { %v110_v41 = vadd.f32 %v109_v38, %v108_v39 }
 0x1d7   :  { %v112_v42 = vmul.f32 %v111_v40, %v110_v41 }
 0x1d9   :  { %113 = vst.msk [vmem:[#allocation10] sm:$0x1] %vm53_vm2, %v112_v42 }
 0x1da   :  { %124 = dma.vmem_to_hbm [thread:$0]  %s120_s28, 16, %s122_s4, [#allocation7]  }
 0x1db   :  { %236 = dma.done.wait [#allocation7], 16  }
 0x1dc   :  { %237 = vsyncadd [#allocation7], 4294967280 }
 0x1dd   :  { %129 = vsyncpa [#allocation6], 1 }
 0x1de   :  { %130 = vsyncpa [#allocation9], 1 }
 0x1df   :  { %131 = vsyncpa [#allocation7], 1 }

</bundles_post_ra>
